<compile_context>
chip_gen: v7x
topology: tpu7x:2x2x1
jax: 0.10.0
libtpu: 0.0.40
codegen_flags: <defaults>
</compile_context>

<pallas_src>
import functools

import jax
import jax.numpy as jnp
from jax.experimental import pallas as pl
from jax.experimental.pallas import tpu as pltpu


def _round8(n):
    return -(-n // 8) * 8


def _rnn_fused_kernel(ids_ref, par_ref, out_ref, *, B, T, BP, V, H, L,
                      off_whh, off_wo, off_bo):
    """Fused one-hot embedding gather + single-layer tanh RNN + Linear.

    ids_ref: (T*BP, 1) int32 time-major token ids, batch padded to BP with -1
    par_ref: (R, W) f32 packed params:
               rows [0, V)               : E' = emb @ W_ih^T + (b_ih + b_hh)
               rows [off_whh, off_whh+H) : W_hh^T
               rows [off_wo,  off_wo+H)  : W_out^T  (first L columns valid)
               row   off_bo              : b_out    (first L columns valid)
    out_ref: (B, L) logits
    """
    TB = T * BP

    # One-hot gather: one VPU compare + one MXU matmul (no serial scalar loads,
    # no VMEM scratch round-trip, no OOB reads for bad ids).
    ids = ids_ref[...]                                                 # (TB, 1)
    one_hot = (ids == jax.lax.broadcasted_iota(jnp.int32, (TB, V), 1)
               ).astype(jnp.float32)                                   # (TB, V)

    ep = par_ref[0:V, :][:, 0:H]                                       # (V, H)
    xp = jnp.dot(one_hot, ep, preferred_element_type=jnp.float32)      # (TB, H)

    whh = par_ref[off_whh:off_whh + H, :][:, 0:H]                      # (H, H)
    # TODO(synk): if the bundle dump shows a per-step RHS push, drive the MXU
    # explicitly (pltpu.matmul_push_rhs once + matmul_acc_lhs/matmul_pop per
    # step) to shorten the serial recurrence chain further.
    h = jnp.zeros((BP, H), jnp.float32)                                # h_0 = 0
    for t in range(T):        # small static T: full unroll, h stays in vregs
        h = jnp.tanh(xp[t * BP:(t + 1) * BP, :]
                     + jnp.dot(h, whh, preferred_element_type=jnp.float32))

    wo = par_ref[off_wo:off_wo + H, :][:, 0:L]                         # (H, L)
    bo = par_ref[off_bo:off_bo + 1, :][:, 0:L]                         # (1, L)
    logits = jnp.dot(h, wo, preferred_element_type=jnp.float32) + bo   # (BP, L)
    out_ref[...] = logits[0:B, :]


def prepare_params(params):
    """One-time weight re-layout + algebraic folds (done at init, not per call)."""
    emb = params["emb"].astype(jnp.float32)                  # (V, D)
    w_ih = params["w_ih"].astype(jnp.float32)                # (H, D)
    w_hh = params["w_hh"].astype(jnp.float32)                # (H, H)
    bias = (params["b_ih"] + params["b_hh"]).astype(jnp.float32)   # (H,)
    w_out = params["w_out"].astype(jnp.float32)              # (L, H)
    b_out = params["b_out"].astype(jnp.float32)              # (L,)

    V = emb.shape[0]
    H = w_hh.shape[0]
    L = w_out.shape[0]

    # Fold embedding + input projection + both RNN biases into one (V, H) table.
    ep = emb @ w_ih.T + bias                                  # (V, H)

    off_whh = _round8(V)
    off_wo = off_whh + _round8(H)
    off_bo = off_wo + _round8(H)
    rows = off_bo + _round8(1)
    width = max(H, L)

    packed = jnp.zeros((rows, width), jnp.float32)
    packed = packed.at[0:V, 0:H].set(ep)
    packed = packed.at[off_whh:off_whh + H, 0:H].set(w_hh.T)
    packed = packed.at[off_wo:off_wo + H, 0:L].set(w_out.T)
    packed = packed.at[off_bo, 0:L].set(b_out)

    cfg = dict(V=V, H=H, L=L, off_whh=off_whh, off_wo=off_wo, off_bo=off_bo)
    return packed, cfg


def make_forward(cfg):
    """Build a jitted forward closed over the (static) packing layout."""
    V, H, L = cfg["V"], cfg["H"], cfg["L"]
    off_whh, off_wo, off_bo = cfg["off_whh"], cfg["off_wo"], cfg["off_bo"]

    @jax.jit
    def forward(x_ids, packed):
        B, T = x_ids.shape
        BP = _round8(B)      # pad batch to a full f32 sublane tile (8 rows)

        # Tiny index prep: time-major layout, padded batch rows use id -1 so
        # their one-hot row is all-zero inside the kernel.
        ids_tb = jnp.full((T, BP), -1, jnp.int32)
        ids_tb = ids_tb.at[:, :B].set(jnp.transpose(x_ids).astype(jnp.int32))
        ids_col = ids_tb.reshape(T * BP, 1)

        kernel = functools.partial(
            _rnn_fused_kernel, B=B, T=T, BP=BP, V=V, H=H, L=L,
            off_whh=off_whh, off_wo=off_wo, off_bo=off_bo)

        return pl.pallas_call(
            kernel,
            out_shape=jax.ShapeDtypeStruct((B, L), jnp.float32),
            in_specs=[pl.BlockSpec(memory_space=pltpu.MemorySpace.VMEM),
                      pl.BlockSpec(memory_space=pltpu.MemorySpace.VMEM)],
            out_specs=pl.BlockSpec(memory_space=pltpu.MemorySpace.VMEM),
            # TODO(synk): if B/V/H ever scale up, add a "parallel" grid axis
            # over batch (v7x has 2 TCs) and switch E' to an HBM-resident
            # table with a DMA gather once it no longer fits v7x's 64 MiB VMEM.
        )(ids_col, packed)

    return forward


def reference_forward(x_ids, params):
    """Pure-JAX reference mirroring the PyTorch module semantics."""
    emb, w_ih, w_hh, b_ih, b_hh, w_out, b_out = (
        params["emb"], params["w_ih"], params["w_hh"],
        params["b_ih"], params["b_hh"], params["w_out"], params["b_out"])
    x = jnp.take(emb, x_ids, axis=0)                         # (B, T, D)
    B, T, _ = x.shape
    H = w_hh.shape[0]
    h = jnp.zeros((B, H), jnp.float32)
    for t in range(T):
        h = jnp.tanh(x[:, t, :] @ w_ih.T + b_ih + h @ w_hh.T + b_hh)
    return h @ w_out.T + b_out


if __name__ == "__main__":
    # Small shapes consistent with the module's forward.
    vocab_size, dim, hidden_size, label_size = 16, 32, 32, 8
    B, T = 2, 8

    key = jax.random.PRNGKey(0)
    ks = jax.random.split(key, 8)
    params = {
        "emb":   jax.random.normal(ks[0], (vocab_size, dim), jnp.float32) * 0.1,
        "w_ih":  jax.random.normal(ks[1], (hidden_size, dim), jnp.float32) * 0.1,
        "w_hh":  jax.random.normal(ks[2], (hidden_size, hidden_size), jnp.float32) * 0.1,
        "b_ih":  jax.random.normal(ks[3], (hidden_size,), jnp.float32) * 0.1,
        "b_hh":  jax.random.normal(ks[4], (hidden_size,), jnp.float32) * 0.1,
        "w_out": jax.random.normal(ks[5], (label_size, hidden_size), jnp.float32) * 0.1,
        "b_out": jax.random.normal(ks[6], (label_size,), jnp.float32) * 0.1,
    }
    x_ids = jax.random.randint(ks[7], (B, T), 0, vocab_size, dtype=jnp.int32)

    packed, cfg = prepare_params(params)
    fwd = make_forward(cfg)

    out = jax.block_until_ready(fwd(x_ids, packed))
    ref = jax.block_until_ready(reference_forward(x_ids, params))

    assert out.shape == (B, label_size), out.shape
    assert jnp.allclose(out, ref, atol=1e-5, rtol=1e-5), (out, ref)
    print("KERNEL_OK")
</pallas_src>

<mosaic_0001>
module attributes {stable_mosaic.version = 11 : i64} {
  func.func @_rnn_fused_kernel(%arg0: memref<64x1xi32, #tpu.memory_space<vmem>>, %arg1: memref<88x32xf32, #tpu.memory_space<vmem>>, %arg2: memref<2x8xf32, #tpu.memory_space<vmem>>) attributes {dimension_semantics = [], scalar_prefetch = 0 : i64, scratch_operands = 0 : i64, tpu.core_type = #tpu.core_type<tc>} {
    %c0 = arith.constant 0 : index
    %c0_0 = arith.constant 0 : index
    %0 = vector.load %arg0[%c0, %c0_0] : memref<64x1xi32, #tpu.memory_space<vmem>>, vector<64x1xi32>
    %1 = tpu.iota {dimensions = array<i32: 1>} : vector<64x16xi32>
    %2 = vector.broadcast %0 : vector<64x1xi32> to vector<64x16xi32>
    %3 = arith.cmpi eq, %2, %1 : vector<64x16xi32>
    %4 = arith.extui %3 : vector<64x16xi1> to vector<64x16xi32>
    %5 = arith.sitofp %4 : vector<64x16xi32> to vector<64x16xf32>
    %c0_1 = arith.constant 0 : index
    %c0_2 = arith.constant 0 : index
    %6 = vector.load %arg1[%c0_1, %c0_2] : memref<88x32xf32, #tpu.memory_space<vmem>>, vector<16x32xf32>
    %cst = arith.constant dense<0.000000e+00> : vector<64x32xf32>
    %7 = tpu.matmul %5, %6, %cst {dimension_numbers = #tpu.dot_dimension_numbers<[1], [0], [0], [1], [0, 0, 1, 1], [], []>} : vector<64x16xf32>, vector<16x32xf32>, vector<64x32xf32> -> vector<64x32xf32>
    %c16 = arith.constant 16 : index
    %c0_3 = arith.constant 0 : index
    %8 = vector.load %arg1[%c16, %c0_3] : memref<88x32xf32, #tpu.memory_space<vmem>>, vector<32x32xf32>
    %cst_4 = arith.constant 0.000000e+00 : f32
    %9 = vector.broadcast %cst_4 : f32 to vector<8x32xf32>
    %10 = vector.extract_strided_slice %7 {offsets = [0, 0], sizes = [8, 32], strides = [1, 1]} : vector<64x32xf32> to vector<8x32xf32>
    %cst_5 = arith.constant dense<0.000000e+00> : vector<8x32xf32>
    %11 = tpu.matmul %9, %8, %cst_5 {dimension_numbers = #tpu.dot_dimension_numbers<[1], [0], [0], [1], [0, 0, 1, 1], [], []>} : vector<8x32xf32>, vector<32x32xf32>, vector<8x32xf32> -> vector<8x32xf32>
    %12 = arith.addf %10, %11 : vector<8x32xf32>
    %13 = math.tanh %12 : vector<8x32xf32>
    %14 = vector.extract_strided_slice %7 {offsets = [8, 0], sizes = [8, 32], strides = [1, 1]} : vector<64x32xf32> to vector<8x32xf32>
    %cst_6 = arith.constant dense<0.000000e+00> : vector<8x32xf32>
    %15 = tpu.matmul %13, %8, %cst_6 {dimension_numbers = #tpu.dot_dimension_numbers<[1], [0], [0], [1], [0, 0, 1, 1], [], []>} : vector<8x32xf32>, vector<32x32xf32>, vector<8x32xf32> -> vector<8x32xf32>
    %16 = arith.addf %14, %15 : vector<8x32xf32>
    %17 = math.tanh %16 : vector<8x32xf32>
    %18 = vector.extract_strided_slice %7 {offsets = [16, 0], sizes = [8, 32], strides = [1, 1]} : vector<64x32xf32> to vector<8x32xf32>
    %cst_7 = arith.constant dense<0.000000e+00> : vector<8x32xf32>
    %19 = tpu.matmul %17, %8, %cst_7 {dimension_numbers = #tpu.dot_dimension_numbers<[1], [0], [0], [1], [0, 0, 1, 1], [], []>} : vector<8x32xf32>, vector<32x32xf32>, vector<8x32xf32> -> vector<8x32xf32>
    %20 = arith.addf %18, %19 : vector<8x32xf32>
    %21 = math.tanh %20 : vector<8x32xf32>
    %22 = vector.extract_strided_slice %7 {offsets = [24, 0], sizes = [8, 32], strides = [1, 1]} : vector<64x32xf32> to vector<8x32xf32>
    %cst_8 = arith.constant dense<0.000000e+00> : vector<8x32xf32>
    %23 = tpu.matmul %21, %8, %cst_8 {dimension_numbers = #tpu.dot_dimension_numbers<[1], [0], [0], [1], [0, 0, 1, 1], [], []>} : vector<8x32xf32>, vector<32x32xf32>, vector<8x32xf32> -> vector<8x32xf32>
    %24 = arith.addf %22, %23 : vector<8x32xf32>
    %25 = math.tanh %24 : vector<8x32xf32>
    %26 = vector.extract_strided_slice %7 {offsets = [32, 0], sizes = [8, 32], strides = [1, 1]} : vector<64x32xf32> to vector<8x32xf32>
    %cst_9 = arith.constant dense<0.000000e+00> : vector<8x32xf32>
    %27 = tpu.matmul %25, %8, %cst_9 {dimension_numbers = #tpu.dot_dimension_numbers<[1], [0], [0], [1], [0, 0, 1, 1], [], []>} : vector<8x32xf32>, vector<32x32xf32>, vector<8x32xf32> -> vector<8x32xf32>
    %28 = arith.addf %26, %27 : vector<8x32xf32>
    %29 = math.tanh %28 : vector<8x32xf32>
    %30 = vector.extract_strided_slice %7 {offsets = [40, 0], sizes = [8, 32], strides = [1, 1]} : vector<64x32xf32> to vector<8x32xf32>
    %cst_10 = arith.constant dense<0.000000e+00> : vector<8x32xf32>
    %31 = tpu.matmul %29, %8, %cst_10 {dimension_numbers = #tpu.dot_dimension_numbers<[1], [0], [0], [1], [0, 0, 1, 1], [], []>} : vector<8x32xf32>, vector<32x32xf32>, vector<8x32xf32> -> vector<8x32xf32>
    %32 = arith.addf %30, %31 : vector<8x32xf32>
    %33 = math.tanh %32 : vector<8x32xf32>
    %34 = vector.extract_strided_slice %7 {offsets = [48, 0], sizes = [8, 32], strides = [1, 1]} : vector<64x32xf32> to vector<8x32xf32>
    %cst_11 = arith.constant dense<0.000000e+00> : vector<8x32xf32>
    %35 = tpu.matmul %33, %8, %cst_11 {dimension_numbers = #tpu.dot_dimension_numbers<[1], [0], [0], [1], [0, 0, 1, 1], [], []>} : vector<8x32xf32>, vector<32x32xf32>, vector<8x32xf32> -> vector<8x32xf32>
    %36 = arith.addf %34, %35 : vector<8x32xf32>
    %37 = math.tanh %36 : vector<8x32xf32>
    %38 = vector.extract_strided_slice %7 {offsets = [56, 0], sizes = [8, 32], strides = [1, 1]} : vector<64x32xf32> to vector<8x32xf32>
    %cst_12 = arith.constant dense<0.000000e+00> : vector<8x32xf32>
    %39 = tpu.matmul %37, %8, %cst_12 {dimension_numbers = #tpu.dot_dimension_numbers<[1], [0], [0], [1], [0, 0, 1, 1], [], []>} : vector<8x32xf32>, vector<32x32xf32>, vector<8x32xf32> -> vector<8x32xf32>
    %40 = arith.addf %38, %39 : vector<8x32xf32>
    %41 = math.tanh %40 : vector<8x32xf32>
    %c48 = arith.constant 48 : index
    %c0_13 = arith.constant 0 : index
    %42 = vector.load %arg1[%c48, %c0_13] : memref<88x32xf32, #tpu.memory_space<vmem>>, vector<32x32xf32>
    %43 = vector.extract_strided_slice %42 {offsets = [0, 0], sizes = [32, 8], strides = [1, 1]} : vector<32x32xf32> to vector<32x8xf32>
    %c80 = arith.constant 80 : index
    %c0_14 = arith.constant 0 : index
    %44 = vector.load %arg1[%c80, %c0_14] : memref<88x32xf32, #tpu.memory_space<vmem>>, vector<1x32xf32>
    %45 = vector.extract_strided_slice %44 {offsets = [0, 0], sizes = [1, 8], strides = [1, 1]} : vector<1x32xf32> to vector<1x8xf32>
    %cst_15 = arith.constant dense<0.000000e+00> : vector<8x8xf32>
    %46 = tpu.matmul %41, %43, %cst_15 {dimension_numbers = #tpu.dot_dimension_numbers<[1], [0], [0], [1], [0, 0, 1, 1], [], []>} : vector<8x32xf32>, vector<32x8xf32>, vector<8x8xf32> -> vector<8x8xf32>
    %47 = vector.broadcast %45 : vector<1x8xf32> to vector<8x8xf32>
    %48 = arith.addf %46, %47 : vector<8x8xf32>
    %49 = vector.extract_strided_slice %48 {offsets = [0, 0], sizes = [2, 8], strides = [1, 1]} : vector<8x8xf32> to vector<2x8xf32>
    %c0_16 = arith.constant 0 : index
    %c0_17 = arith.constant 0 : index
    %50 = vector.load %arg2[%c0_16, %c0_17] : memref<2x8xf32, #tpu.memory_space<vmem>>, vector<2x8xf32>
    tpu.vector_store %arg2[%c0_16, %c0_17], %49 {strides = array<i32>} : memref<2x8xf32, #tpu.memory_space<vmem>>, vector<2x8xf32>,
    return
  }
}

</mosaic_0001>

<bundles_post_ra>
// kernel: forward.1
= control target key start
LH: loop header
LB: loop body
LE: loop exit
PB: predicated region body
PF: predicated region fallthrough
CT: control target
= control target key end

     0   :  { %v1205_v2 = vmov 0   ;;  %v1206_v7 = vmov 0.0|0.0   ;;  %s1378_s0 = inlined_call_operand.vmem [shape: s32[64,1], index: 0, kind: input, shape index: {}]   ;;  %s1379_s1 = inlined_call_operand.vmem [shape: f32[88,32], index: 1, kind: input, shape index: {}]   ;;  %s1380_s2 = inlined_call_operand.hbm [shape: f32[2,8], index: 2, kind: output, shape index: {}]  }
   0x1   :  { %v12_v0 = vld [vmem:[%s1378_s0] sm:$0xff]  ;;  %v14_v1 = vld [vmem:[%s1378_s0 + $0x10] sm:$0xff]  ;;  %1163 = vset.pattern.permute.xlu0 %v1205_v2  ;;  %1164 = vset.pattern.permute.xlu1 %v1205_v2  ;;  %v13_v3 = vld [vmem:[%s1378_s0 + $0x8] sm:$0xff] }
   0x2   :  { %23 = vperm.xlu0 %1163, %v12_v0   ;;  %29 = vperm.xlu1 %1164, %v14_v1   ;;  %v15_v4 = vld [vmem:[%s1378_s0 + $0x18] sm:$0xff]  ;;  %v202_v5 = vld [vmem:[%s1379_s1 + $0x10] sm:$0xff]  ;;  %v70_v9 = vld [vmem:[%s1379_s1] sm:$0xff] }
   0x3   :  { %v203_v6 = vld [vmem:[%s1379_s1 + $0x18] sm:$0xff]  ;;  %1104 = vmatprep.subr.bf16.mxu1 %v1206_v7  ;;  %v71_v10 = vld [vmem:[%s1379_s1 + $0x8] sm:$0xff]  ;;  %v204_v11 = vld [vmem:[%s1379_s1 + $0x20] sm:$0xff] }
   0x4   :  { %v1244_v8 = vpack.c.bf16 %v203_v6, %v202_v5  ;;  %v1100_v12 = vpack.c.bf16 %v71_v10, %v70_v9  ;;  %v205_v13 = vld [vmem:[%s1379_s1 + $0x28] sm:$0xff] }
   0x5   :  { %7 = vsyncpa [#allocation3], 0  ;;  %v1259_v14 = vpack.c.bf16 %v205_v13, %v204_v11  ;;  %v16_v15 = vld [vmem:[%s1378_s0 + $0x20] sm:$0xff]  ;;  %v17_v16 = vld [vmem:[%s1378_s0 + $0x28] sm:$0xff]  ;;  %vm1207_vm0 = vmmov 0   ;;  %v1208_v17 = vmov 0.0   ;;  %v20_v19 = vlaneseq }
   0x6   :  { %1106 = vmatpush3.bf16.msra.mxu1 %v1244_v8  ;;  %26 = vperm.xlu0 %1163, %v13_v3   ;;  %v18_v18 = vld [vmem:[%s1378_s0 + $0x30] sm:$0xff]  ;;  %vm72_vm1 = vcmask 130048   ;;  %v19_v37 = vld [vmem:[%s1378_s0 + $0x38] sm:$0xff]  ;;  %vm206_vm9 = vcmask 261120   ;;  %v809_v13 = vld [vmem:[%s1379_s1 + $0x40] sm:$0xff]  ;;  %s1209_s18 = smov [#allocation2]  }
   0x7   :  { %32 = vperm.xlu1 %1164, %v15_v4   ;;  %1101 = vmatprep.subr.bf16.mxu0 %v1100_v12  ;;  %v21_v20 = vand.u32 127, %v20_v19  ;;  %v807_v11 = vld [vmem:[%s1379_s1 + $0x30] sm:$0xff]  ;;  %s897_s19 = sshll.u32 %s1209_s18, 4  ;;  %vm889_vm11 = vcmask 58368   ;;  %s898_s19 = int_to_ptr.vmem [resolvable:$true] %s897_s19 }
   0x8   :  { %1107 = vmatprep.subr.bf16.mxu1 %v1206_v7  ;;  %1103 = vmatpush3.bf16.msra.mxu0 %v1100_v12  ;;  %v808_v12 = vld [vmem:[%s1379_s1 + $0x38] sm:$0xff]  ;;  %s1181_s20 = scalar_lea.vmem %s898_s19, 32  ;;  %p1186_p1 = scmp.lt.s32.totalorder %s898_s19, %s898_s19 }
   0x9   :  { %1009 = vmatprep.mubr.msk.f32.mxu1 %vm1207_vm0, %v1208_v17  ;;  %1116 = vmatprep.subr.bf16.mxu0 %v1206_v7  ;;  %p1182_p0 = scmp.ne.s32.totalorder %s898_s19, %s1181_s20  ;;  %p1187_p2 = scmp.lt.s32.totalorder %s1181_s20, %s1181_s20 }
   0xa   :  { %1109 = vmatpush3.bf16.msra.mxu1 %v1259_v14  ;;  %35 = vperm.xlu0 %1163, %v16_v15   ;;  %v810_v15 = vld [vmem:[%s1379_s1 + $0x48] sm:$0xff] }
   0xb   :  { %38 = vperm.xlu1 %1164, %v17_v16   ;;  %1110 = vmatprep.subr.bf16.mxu1 %v1206_v7  ;;  %v1156_v16 = vpack.c.bf16 %v810_v15, %v809_v13  ;;  %p1188_p3 = por %p1187_p2, %p1186_p1 }
   0xd   :  { %1010 = vmatmul.mubr.f32.vlgmr.msra.gmra.mrb[0].mxu1 %v1208_v17  ;;  %p1189_p4 = pnand %p1188_p3, %p1182_p0 }
   0xe   :  { %1112 = vmatpush3.bf16.msra.mxu1 %v1244_v8  ;;  %1020 = vmatprep.mubr.msk.f32.mxu1 %vm1207_vm0, %v1208_v17 }
   0xf   :  { %41 = vperm.xlu0 %1163, %v18_v18   ;;  %1113 = vmatprep.subr.bf16.mxu1 %v1206_v7 }
  0x10   :  { %44 = vperm.xlu1 %1164, %v19_v37  }
  0x12   :  { %1115 = vmatpush3.bf16.msra.mxu1 %v1259_v14 }
  0x13   :  { %1122 = vmatprep.subr.bf16.mxu1 %v1206_v7 }
  0x81   :  { %v24_v21 = vpop.permute.xlu0 %23  ;;  %v30_v22 = vpop.permute.xlu1 %29 }
  0x82   :  { %vm46_vm2 = vcmp.eq.s32.totalorder %v24_v21, %v21_v20  ;;  %vm48_vm3 = vcmp.eq.s32.totalorder %v30_v22, %v21_v20  ;;  %v928_v21 = vld [vmem:[%s1379_s1 + $0x50] ss:$0 sm:$0xff] }
  0x83   :  { %v905_v23 = vsel %vm46_vm2, 1.0, %v1208_v17  ;;  %v907_v26 = vsel %vm48_vm3, 1.0, %v1208_v17 }
  0x84   :  { %989 = vmatprep.mubr.msk.f32.mxu0 %vm72_vm1, %v905_v23 }
  0x85   :  { %v27_v24 = vpop.permute.xlu0 %26 }
  0x86   :  { %v33_v25 = vpop.permute.xlu1 %32  ;;  %vm47_vm4 = vcmp.eq.s32.totalorder %v27_v24, %v21_v20 }
  0x87   :  { %vm49_vm5 = vcmp.eq.s32.totalorder %v33_v25, %v21_v20  ;;  %v906_v27 = vsel %vm47_vm4, 1.0, %v1208_v17 }
  0x88   :  { %990 = vmatmul.mubr.msk.f32.vlgmr.msra.gmra.mrb[0].mxu0 %vm72_vm1, %v906_v27  ;;  %v908_v28 = vsel %vm49_vm5, 1.0, %v1208_v17 }
  0x89   :  { %v36_v29 = vpop.permute.xlu0 %35  ;;  %992 = vmatprep.mubr.msk.f32.mxu0 %vm72_vm1, %v907_v26  ;;  %1118 = vmatpush3.bf16.msra.mxu0 %v1244_v8 }
  0x8a   :  { %v39_v30 = vpop.permute.xlu1 %38  ;;  %vm50_vm6 = vcmp.eq.s32.totalorder %v36_v29, %v21_v20  ;;  %1119 = vmatprep.subr.bf16.mxu0 %v1206_v7 }
  0x8b   :  { %vm51_vm7 = vcmp.eq.s32.totalorder %v39_v30, %v21_v20  ;;  %v909_v31 = vsel %vm50_vm6, 1.0, %v1208_v17 }
  0x8c   :  { %993 = vmatmul.mubr.msk.f32.gmra.mrb[2].mxu0 %vm72_vm1, %v908_v28  ;;  %v910_v32 = vsel %vm51_vm7, 1.0, %v1208_v17 }
  0x8d   :  { %995 = vmatprep.mubr.msk.f32.mxu0 %vm72_vm1, %v909_v31  ;;  %1121 = vmatpush3.bf16.msra.mxu0 %v1259_v14 }
  0x8e   :  { %v42_v33 = vpop.permute.xlu0 %41  ;;  %1128 = vmatprep.subr.bf16.mxu0 %v1206_v7 }
  0x8f   :  { %vm52_vm8 = vcmp.eq.s32.totalorder %v42_v33, %v21_v20  ;;  %v45_v42 = vpop.permute.xlu1 %44 }
  0x90   :  { %v911_v34 = vsel %vm52_vm8, 1.0, %v1208_v17  ;;  %996 = vmatmul.mubr.msk.f32.gmra.mrb[4].mxu0 %vm72_vm1, %v910_v32  ;;  %vm53_vm10 = vcmp.eq.s32.totalorder %v45_v42, %v21_v20 }
  0x91   :  { %998 = vmatprep.mubr.msk.f32.mxu0 %vm72_vm1, %v911_v34  ;;  %v912_v43 = vsel %vm53_vm10, 1.0, %v1208_v17 }
  0x94   :  { %999 = vmatmul.mubr.msk.f32.gmra.mrb[6].mxu0 %vm72_vm1, %v912_v43 }
  0x95   :  { %1031 = vmatprep.mubr.msk.f32.mxu0 %vm1207_vm0, %v1208_v17 }
  0xe0   :  { %v276_v35 = vpop.f32.mrb[0].mxu1 }
  0xe1   :  { %v1011_v36 = vpop.f32.mrb[1].mxu1 }
 0x15b   :  { %v991_v38 = vpop.f32.mrb[0].mxu0 }
 0x15c   :  { %v163_v39 = vpop.f32.mrb[1].mxu0 }
 0x15d   :  { %v280_v40 = vadd.f32 %v276_v35, %v163_v39 }
 0x15f   :  { %1165 = vtanh.f32 %v280_v40  ;;  %v994_v44 = vpop.f32.mrb[2].mxu0 }
 0x160   :  { %v173_v45 = vpop.f32.mrb[3].mxu0 }
 0x163   :  { %v997_v46 = vpop.f32.mrb[4].mxu0 }
 0x164   :  { %v183_v47 = vpop.f32.mrb[5].mxu0 }
 0x167   :  { %v1315_v51 = vpop.f32.mrb[6].mxu0 }
 0x168   :  { %v193_v52 = vpop.f32.mrb[7].mxu0 }
 0x169   :  { %v1166_v41 = vpop.eup %1165 }
 0x16a   :  { %1021 = vmatmul.mubr.msk.f32.vlgmr.msra.gmra.mrb[2].mxu1 %vm206_vm9, %v1166_v41 }
 0x16b   :  { %1124 = vmatpush3.bf16.msra.mxu1 %v1244_v8  ;;  %1042 = vmatprep.mubr.msk.f32.mxu1 %vm1207_vm0, %v1208_v17 }
 0x16c   :  { %1125 = vmatprep.subr.bf16.mxu1 %v1206_v7 }
 0x16f   :  { %1127 = vmatpush3.bf16.msra.mxu1 %v1259_v14 }
 0x170   :  { %1134 = vmatprep.subr.bf16.mxu1 %v1206_v7 }
 0x23d   :  { %v351_v48 = vpop.f32.mrb[2].mxu1 }
 0x23e   :  { %v355_v49 = vadd.f32 %v991_v38, %v351_v48  ;;  %v1022_v50 = vpop.f32.mrb[3].mxu1 }
 0x240   :  { %1167 = vtanh.f32 %v355_v49 }
 0x24a   :  { %v1168_v53 = vpop.eup %1167 }
 0x24b   :  { %1032 = vmatmul.mubr.msk.f32.vlgmr.msra.gmra.mrb[8].mxu0 %vm206_vm9, %v1168_v53 }
 0x24c   :  { %1130 = vmatpush3.bf16.msra.mxu0 %v1244_v8  ;;  %1053 = vmatprep.mubr.msk.f32.mxu0 %vm1207_vm0, %v1208_v17 }
 0x24d   :  { %1131 = vmatprep.subr.bf16.mxu0 %v1206_v7 }
 0x250   :  { %1133 = vmatpush3.bf16.msra.mxu0 %v1259_v14 }
 0x251   :  { %1140 = vmatprep.subr.bf16.mxu0 %v1206_v7 }
 0x31e   :  { %v426_v54 = vpop.f32.mrb[8].mxu0 }
 0x31f   :  { %v430_v55 = vadd.f32 %v426_v54, %v173_v45  ;;  %v1033_v56 = vpop.f32.mrb[9].mxu0 }
 0x321   :  { %1169 = vtanh.f32 %v430_v55 }
 0x32b   :  { %v1170_v57 = vpop.eup %1169 }
 0x32c   :  { %1043 = vmatmul.mubr.msk.f32.vlgmr.msra.gmra.mrb[4].mxu1 %vm206_vm9, %v1170_v57 }
 0x32d   :  { %1136 = vmatpush3.bf16.msra.mxu1 %v1244_v8  ;;  %1064 = vmatprep.mubr.msk.f32.mxu1 %vm1207_vm0, %v1208_v17 }
 0x32e   :  { %1137 = vmatprep.subr.bf16.mxu1 %v1206_v7 }
 0x331   :  { %1139 = vmatpush3.bf16.msra.mxu1 %v1259_v14 }
 0x332   :  { %1146 = vmatprep.subr.bf16.mxu1 %v1206_v7 }
 0x3ff   :  { %v501_v58 = vpop.f32.mrb[4].mxu1 }
 0x400   :  { %v505_v59 = vadd.f32 %v994_v44, %v501_v58  ;;  %v1044_v60 = vpop.f32.mrb[5].mxu1 }
 0x402   :  { %1171 = vtanh.f32 %v505_v59 }
 0x40c   :  { %v1172_v61 = vpop.eup %1171 }
 0x40d   :  { %1054 = vmatmul.mubr.msk.f32.vlgmr.msra.gmra.mrb[10].mxu0 %vm206_vm9, %v1172_v61 }
 0x40e   :  { %1142 = vmatpush3.bf16.msra.mxu0 %v1244_v8  ;;  %1075 = vmatprep.mubr.msk.f32.mxu0 %vm1207_vm0, %v1208_v17 }
 0x40f   :  { %1143 = vmatprep.subr.bf16.mxu0 %v1206_v7 }
 0x412   :  { %1145 = vmatpush3.bf16.msra.mxu0 %v1259_v14 }
 0x413   :  { %1152 = vmatprep.subr.bf16.mxu0 %v1206_v7 }
 0x4e0   :  { %v576_v62 = vpop.f32.mrb[10].mxu0 }
 0x4e1   :  { %v580_v63 = vadd.f32 %v576_v62, %v183_v47  ;;  %v1055_v0 = vpop.f32.mrb[11].mxu0 }
 0x4e3   :  { %1173 = vtanh.f32 %v580_v63 }
 0x4ed   :  { %v1174_v1 = vpop.eup %1173 }
 0x4ee   :  { %1065 = vmatmul.mubr.msk.f32.vlgmr.msra.gmra.mrb[6].mxu1 %vm206_vm9, %v1174_v1 }
 0x4ef   :  { %1148 = vmatpush3.bf16.msra.mxu1 %v1244_v8  ;;  %1086 = vmatprep.mubr.msk.f32.mxu1 %vm1207_vm0, %v1208_v17 }
 0x4f0   :  { %1149 = vmatprep.subr.bf16.mxu1 %v1206_v7 }
 0x4f3   :  { %1151 = vmatpush3.bf16.msra.mxu1 %v1259_v14  ;;  %v1153_v14 = vpack.c.bf16 %v808_v12, %v807_v11 }
 0x5c1   :  { %v651_v2 = vpop.f32.mrb[6].mxu1 }
 0x5c2   :  { %v655_v3 = vadd.f32 %v997_v46, %v651_v2  ;;  %v1066_v4 = vpop.f32.mrb[7].mxu1 }
 0x5c4   :  { %1175 = vtanh.f32 %v655_v3 }
 0x5ce   :  { %v1176_v5 = vpop.eup %1175 }
 0x5cf   :  { %1076 = vmatmul.mubr.msk.f32.vlgmr.msra.gmra.mrb[12].mxu0 %vm206_vm9, %v1176_v5 }
 0x5d0   :  { %1097 = vmatprep.mubr.msk.f32.mxu0 %vm1207_vm0, %v1208_v17  ;;  %1154 = vmatpush3.bf16.msra.mxu0 %v1153_v14 }
 0x5d1   :  { %1155 = vmatprep.subr.bf16.mxu0 %v1206_v7 }
 0x5d4   :  { %1157 = vmatpush3.bf16.msra.mxu0 %v1156_v16 }
 0x6a2   :  { %v726_v6 = vpop.f32.mrb[12].mxu0 }
 0x6a3   :  { %v730_v9 = vadd.f32 %v726_v6, %v193_v52  ;;  %v1077_v8 = vpop.f32.mrb[13].mxu0 }
 0x6a5   :  { %1177 = vtanh.f32 %v730_v9 }
 0x6af   :  { %v1178_v10 = vpop.eup %1177 }
 0x6b0   :  { %1087 = vmatmul.mubr.msk.f32.vlgmr.msra.gmra.mrb[8].mxu1 %vm206_vm9, %v1178_v10 }
 0x783   :  { %v801_v17 = vpop.f32.mrb[8].mxu1 }
 0x784   :  { %v805_v18 = vadd.f32 %v1315_v51, %v801_v17  ;;  %v1088_v19 = vpop.f32.mrb[9].mxu1 }
 0x786   :  { %1179 = vtanh.f32 %v805_v18 }
 0x790   :  { %v1180_v20 = vpop.eup %1179 }
 0x791   :  { %1098 = vmatmul.mubr.msk.f32.vlgmr.msra.gmra.mrb[14].mxu0 %vm206_vm9, %v1180_v20 }
 0x864   :  { %v885_v22 = vpop.f32.mrb[14].mxu0 }
 0x865   :  { %v886_v23 = vadd.f32 %v928_v21, %v885_v22  ;;  %v1099_v24 = vpop.f32.mrb[15].mxu0 }
 0x867   :  { %890 = vst.msk [vmem:[#allocation2] sm:$0x3] %vm889_vm11, %v886_v23 }
 0x868   :  { %1192 = shalt.err (!%p1189_p4)
}
 0x869   :  { %s1193_s23 = scalar_lea.hbm %s1380_s2, 32 }
 0x86a   :  { %p1194_p5 = scmp.ne.s32.totalorder %s1380_s2, %s1193_s23  ;;  %p1197_p6 = scmp.lt.u32.totalorder %s1193_s23, %s1380_s2 }
 0x86c   :  { %p1199_p7 = pnand %p1197_p6, %p1194_p5 }
 0x86e   :  { %1202 = shalt.err (!%p1199_p7)
}
 0x86f   :  { %900 = dma.vmem_to_hbm [thread:$0]  %s898_s19, 32, %s1380_s2, [#allocation3]  }
 0x870   :  { %1203 = dma.done.wait [#allocation3], 32  }
 0x871   :  { %1204 = vsyncadd [#allocation3], 4294967264 }
 0x872   :  { %904 = vsyncpa [#allocation3], 1 }

</bundles_post_ra>
